<compile_context>
chip_gen: v7x
topology: tpu7x:2x2x1
jax: 0.10.0
libtpu: 0.0.40
codegen_flags: <defaults>
</compile_context>

<pallas_src>
import random

import jax
import jax.numpy as jnp
from jax.experimental import pallas as pl
from jax.experimental.pallas import tpu as pltpu


def _round_up(a, b):
    return ((a + b - 1) // b) * b


def _pick_tile(dim, unit, max_tile):
    """Largest multiple of `unit` that divides `dim` and is <= max_tile."""
    best = unit
    t = unit
    lim = min(dim, max_tile)
    while t <= lim:
        if dim % t == 0:
            best = t
        t += unit
    return best


# ------------------------------------------------------------------ pass 1
def _row_sum_kernel(x_ref, sum_ref, acc_ref):
    """Accumulate per-row sums over the tiled last axis (reduction grid axis)."""
    j = pl.program_id(1)

    @pl.when(j == 0)
    def _init():
        acc_ref[...] = jnp.zeros_like(acc_ref)

    acc_ref[...] += jnp.sum(x_ref[...].astype(jnp.float32), axis=1,
                            keepdims=True)

    @pl.when(j == pl.num_programs(1) - 1)
    def _fini():
        sum_ref[...] = acc_ref[...]


# ------------------------------------------------------------------ pass 2
def _apply_kernel(x_ref, mean_ref, mask_ref, o_ref):
    """out = x * (1 - m) + mean * m  (mean/mask are (TM,1), lane-broadcast)."""
    x = x_ref[...].astype(jnp.float32)
    mu = mean_ref[...]                      # (TM, 1) f32
    m = mask_ref[...]                       # (TM, 1) f32 in {0, 1}
    o_ref[...] = (x * (1.0 - m) + mu * m).astype(o_ref.dtype)


def batch_ablation_forward(x, key, *, p=0.5, q=0.3, training=True):
    """JAX/Pallas equivalent of BatchAblation.forward.

    x:   (N, C, *spatial) array, channel axis = 1 (NCHW in the common case).
    key: jax.random key; replaces torch's global RNG for the per-channel draw.
    """
    # Python-level gate, identical to the torch module's control flow.
    if random.random() > q or not training:
        return x

    shape = x.shape
    N, C = shape[0], shape[1]
    spatial = 1
    for d in shape[2:]:
        spatial *= d

    rows, hw = N * C, spatial
    x2d = x.reshape(rows, hw)

    # Tiling: lane-dense last dim (multiple of 128), sublane dim multiple of 8.
    hw_pad = _round_up(hw, 128)
    rows_pad = _round_up(rows, 8)
    TH = _pick_tile(hw_pad, 128, 1024)      # blocks up to 512x1024 f32 = 2 MiB
    TM = _pick_tile(rows_pad, 8, 512)

    if (rows_pad, hw_pad) != (rows, hw):
        x2d = jnp.pad(x2d, ((0, rows_pad - rows), (0, hw_pad - hw)))

    itemsize = jnp.dtype(x.dtype).itemsize
    grid = (rows_pad // TM, hw_pad // TH)

    # ----------------------- pass 1: per-(n,c)-row sums --------------------
    row_sums = pl.pallas_call(
        _row_sum_kernel,
        out_shape=jax.ShapeDtypeStruct((rows_pad, 1), jnp.float32),
        grid=grid,
        in_specs=[pl.BlockSpec((TM, TH), lambda i, j: (i, j))],
        out_specs=pl.BlockSpec((TM, 1), lambda i, j: (i, 0)),
        scratch_shapes=[pltpu.VMEM((TM, 1), jnp.float32)],
        compiler_params=pltpu.CompilerParams(
            dimension_semantics=("parallel", "arbitrary"),
            vmem_limit_bytes=32 * 1024 * 1024),
        cost_estimate=pl.CostEstimate(
            flops=rows_pad * hw_pad,
            transcendentals=0,
            bytes_accessed=rows_pad * hw_pad * itemsize + rows_pad * 4),
    )(x2d)

    # Tiny (N, C) fold; divide by the TRUE element count (padding added zeros).
    ch_mean = row_sums[:rows, 0].reshape(N, C).sum(axis=0) / jnp.float32(
        N * spatial)

    # Per-channel uniform draw (replaces torch.rand on the global RNG).
    rand = jax.random.uniform(key, (C,), dtype=jnp.float32)
    mean_mask = (rand < p).astype(jnp.float32)     # 1.0 -> replace with mean

    # Broadcast to per-(n,c) rows and pad to the tiled row count.
    row_mean = jnp.pad(jnp.tile(ch_mean, N), (0, rows_pad - rows))
    row_mask = jnp.pad(jnp.tile(mean_mask, N), (0, rows_pad - rows))
    row_mean = row_mean.reshape(rows_pad, 1).astype(jnp.float32)
    row_mask = row_mask.reshape(rows_pad, 1).astype(jnp.float32)

    # ----------------------- pass 2: per-channel blend ---------------------
    out2d = pl.pallas_call(
        _apply_kernel,
        out_shape=jax.ShapeDtypeStruct((rows_pad, hw_pad), x.dtype),
        grid=grid,
        in_specs=[
            pl.BlockSpec((TM, TH), lambda i, j: (i, j)),
            pl.BlockSpec((TM, 1), lambda i, j: (i, 0)),
            pl.BlockSpec((TM, 1), lambda i, j: (i, 0)),
        ],
        out_specs=pl.BlockSpec((TM, TH), lambda i, j: (i, j)),
        compiler_params=pltpu.CompilerParams(
            dimension_semantics=("parallel", "parallel"),
            vmem_limit_bytes=32 * 1024 * 1024),
        cost_estimate=pl.CostEstimate(
            flops=3 * rows_pad * hw_pad,
            transcendentals=0,
            bytes_accessed=2 * rows_pad * hw_pad * itemsize + 2 * rows_pad * 4),
    )(x2d, row_mean, row_mask)

    return out2d[:rows, :hw].reshape(shape)


if __name__ == "__main__":
    random.seed(0)

    key = jax.random.PRNGKey(0)
    xkey, mkey = jax.random.split(key)
    x = jax.random.normal(xkey, (2, 4, 16, 16), dtype=jnp.float32)

    p, q = 0.5, 1.0          # q=1 -> ablation branch always taken in training
    y = batch_ablation_forward(x, mkey, p=p, q=q, training=True)
    y = jax.block_until_ready(y)

    assert y.shape == x.shape and y.dtype == x.dtype

    # Pure-JAX reference of the torch forward (same per-channel draw).
    ch_mean = jnp.mean(x, axis=(0, 2, 3))
    rand = jax.random.uniform(mkey, (x.shape[1],), dtype=jnp.float32)
    m = (rand < p).astype(jnp.float32)[None, :, None, None]
    mean_b = ch_mean[None, :, None, None]
    expected = x * (1.0 - m) + mean_b * m

    err = float(jnp.max(jnp.abs(y - expected)))
    assert jnp.allclose(y, expected, atol=1e-5, rtol=1e-5), err

    # Eval mode (or losing the q-draw) returns the input unchanged.
    y_eval = batch_ablation_forward(x, mkey, p=p, q=q, training=False)
    assert bool(jnp.all(y_eval == x))

    print("KERNEL_OK")
</pallas_src>

<mosaic_0001>
module attributes {stable_mosaic.version = 11 : i64} {
  func.func @_row_sum_kernel(%arg0: i32, %arg1: i32, %arg2: memref<8x256xf32, #tpu.memory_space<vmem>>, %arg3: memref<8x1xf32, #tpu.memory_space<vmem>>, %arg4: memref<8x1xf32, #tpu.memory_space<vmem>>) attributes {dimension_semantics = [#tpu.dimension_semantics<parallel>, #tpu.dimension_semantics<arbitrary>], iteration_bounds = array<i64: 1, 1>, scalar_prefetch = 0 : i64, scratch_operands = 1 : i64, tpu.core_type = #tpu.core_type<tc>, window_params = [{transform_indices = @transform_0, window_bounds = array<i64: 8, 256>}, {transform_indices = @transform_1, window_bounds = array<i64: 8, 1>}]} {
    %c0_i32 = arith.constant 0 : i32
    %0 = arith.cmpi eq, %arg1, %c0_i32 : i32
    %1 = arith.extui %0 : i1 to i32
    %c0_i32_0 = arith.constant 0 : i32
    %2 = arith.cmpi ne, %1, %c0_i32_0 : i32
    scf.if %2 {
      %cst_8 = arith.constant 0.000000e+00 : f32
      %12 = vector.broadcast %cst_8 : f32 to vector<8x1xf32>
      %c0_9 = arith.constant 0 : index
      %c0_10 = arith.constant 0 : index
      %13 = vector.load %arg4[%c0_9, %c0_10] : memref<8x1xf32, #tpu.memory_space<vmem>>, vector<8x1xf32>
      tpu.vector_store %arg4[%c0_9, %c0_10], %12 {strides = array<i32>} : memref<8x1xf32, #tpu.memory_space<vmem>>, vector<8x1xf32>,
    } else {
    }
    %c0 = arith.constant 0 : index
    %c0_1 = arith.constant 0 : index
    %3 = vector.load %arg4[%c0, %c0_1] : memref<8x1xf32, #tpu.memory_space<vmem>>, vector<8x1xf32>
    %c0_2 = arith.constant 0 : index
    %c0_3 = arith.constant 0 : index
    %4 = vector.load %arg2[%c0_2, %c0_3] : memref<8x256xf32, #tpu.memory_space<vmem>>, vector<8x256xf32>
    %cst = arith.constant dense<0.000000e+00> : vector<8xf32>
    %5 = vector.multi_reduction <add>, %4, %cst [1] : vector<8x256xf32> to vector<8xf32>
    %6 = vector.shape_cast %5 : vector<8xf32> to vector<8x1xf32>
    %7 = arith.addf %3, %6 : vector<8x1xf32>
    %c0_4 = arith.constant 0 : index
    %c0_5 = arith.constant 0 : index
    %8 = vector.load %arg4[%c0_4, %c0_5] : memref<8x1xf32, #tpu.memory_space<vmem>>, vector<8x1xf32>
    tpu.vector_store %arg4[%c0_4, %c0_5], %7 {strides = array<i32>} : memref<8x1xf32, #tpu.memory_space<vmem>>, vector<8x1xf32>,
    %c0_i32_6 = arith.constant 0 : i32
    %9 = arith.cmpi eq, %arg1, %c0_i32_6 : i32
    %10 = arith.extui %9 : i1 to i32
    %c0_i32_7 = arith.constant 0 : i32
    %11 = arith.cmpi ne, %10, %c0_i32_7 : i32
    scf.if %11 {
      %c0_8 = arith.constant 0 : index
      %c0_9 = arith.constant 0 : index
      %12 = vector.load %arg4[%c0_8, %c0_9] : memref<8x1xf32, #tpu.memory_space<vmem>>, vector<8x1xf32>
      %c0_10 = arith.constant 0 : index
      %c0_11 = arith.constant 0 : index
      %13 = vector.load %arg3[%c0_10, %c0_11] : memref<8x1xf32, #tpu.memory_space<vmem>>, vector<8x1xf32>
      tpu.vector_store %arg3[%c0_10, %c0_11], %12 {strides = array<i32>} : memref<8x1xf32, #tpu.memory_space<vmem>>, vector<8x1xf32>,
    } else {
    }
    return
  }
  func.func @transform_0(%arg0: i32, %arg1: i32) -> (i32, i32) {
    %c0_i32 = arith.constant 0 : i32
    return %arg0, %arg1 : i32, i32
  }
  func.func @transform_1(%arg0: i32, %arg1: i32) -> (i32, i32) {
    %c0_i32 = arith.constant 0 : i32
    %c0_i32_0 = arith.constant 0 : i32
    return %arg0, %c0_i32 : i32, i32
  }
}

</mosaic_0001>

<bundles_post_ra>
// kernel: tpu_custom_call.1
= control target key start
LH: loop header
LB: loop body
LE: loop exit
PB: predicated region body
PF: predicated region fallthrough
CT: control target
= control target key end

     0   :  { %6 = vsyncpa [#allocation4], 0  ;;  %s71_s6 = smov [#allocation3]   ;;  %s98_s0 = inlined_call_operand.hbm [shape: f32[8,256], index: 0, kind: input, shape index: {}]   ;;  %s99_s1 = inlined_call_operand.vmem [shape: f32[8,1], index: 1, kind: output, shape index: {}]  }
   0x1   :  { %s13_s7 = sshll.u32 %s71_s6, 4  ;;  %s47_s10 = scalar_lea.hbm %s98_s0, 256  ;;  %s14_s7 = int_to_ptr.vmem [resolvable:$true] %s13_s7 }
   0x2   :  { %p48_p0 = scmp.ne.s32.totalorder %s98_s0, %s47_s10  ;;  %p51_p1 = scmp.lt.u32.totalorder %s47_s10, %s98_s0 }
   0x4   :  { %p53_p2 = pnand %p51_p1, %p48_p0 }
   0x6   :  { %56 = shalt.err (!%p53_p2)
}
   0x7   :  { %s57_s15 = scalar_lea.vmem %s14_s7, 256  ;;  %p62_p4 = scmp.lt.s32.totalorder %s14_s7, %s14_s7 }
   0x8   :  { %p58_p3 = scmp.ne.s32.totalorder %s14_s7, %s57_s15  ;;  %p63_p5 = scmp.lt.s32.totalorder %s57_s15, %s57_s15 }
   0xa   :  { %p64_p6 = por %p63_p5, %p62_p4 }
   0xc   :  { %p65_p7 = pnand %p64_p6, %p58_p3 }
   0xe   :  { %68 = shalt.err (!%p65_p7)
}
   0xf   :  { %16 = dma.hbm_to_vmem [thread:$0]  %s98_s0, 256, %s14_s7, [#allocation4]  }
  0x10   :  { %69 = dma.done.wait [#allocation4], 256  }
  0x11   :  { %70 = vsyncadd [#allocation4], 4294967040  ;;  %vm24_vm0 = vcmask 7168   ;;  %v72_v0 = vmov 0.0   ;;  %v27_v1 = vld [vmem:[#allocation3] sm:$0xff]  ;;  %v28_v2 = vld [vmem:[#allocation3 + $0x8] sm:$0xff] }
  0x12   :  { %25 = vst.msk [vmem:[#allocation2] sm:$0xff] %vm24_vm0, %v72_v0  ;;  %v29_v3 = vadd.f32 %v28_v2, %v27_v1 }
  0x14   :  { %30 = vadd.xlane.f32.xlu0 %v29_v3 }
  0x19   :  { %v26_v4 = vld [vmem:[#allocation2] sm:$0xff] }
  0xa1   :  { %v31_v5 = vpop.xlane.xlu0 %30 }
  0xa2   :  { %v32_v6 = vadd.f32 %v31_v5, %v26_v4 }
  0xa4   :  { %34 = vst.msk [vmem:[#allocation2] sm:$0xff] %vm24_vm0, %v32_v6 }
  0xab   :  { %v38_v7 = vld [vmem:[#allocation2] sm:$0xff] }
  0xac   :  { %39 = vst.msk [vmem:[%s99_s1] sm:$0xff] %vm24_vm0, %v38_v7 }
  0xad   :  { %44 = vsyncpa [#allocation4], 1 }

</bundles_post_ra>
